<compile_context>
chip_gen: v5e
topology: v5e:2x2
jax: 0.10.0
libtpu: 0.0.40
codegen_flags: <defaults>
</compile_context>

<pallas_src>
import functools

import jax
import jax.numpy as jnp
from jax.experimental import pallas as pl
from jax.experimental.pallas import tpu as pltpu


# ----------------------------- kernels ---------------------------------------


def _ffn_kernel_accum_out(x_ref, w13_ref, w2_ref, o_ref, *, th):
    """f32-output variant: accumulate directly into the resident output block."""
    # x_ref:   (tm, dim)    input dtype (cast to bf16 in-kernel)
    # w13_ref: (dim, 2*th)  bf16 fused [W1_k | W3_k] tile
    # w2_ref:  (th, dim)    bf16 down-projection tile
    # o_ref:   (tm, dim)    f32 output, resident across the hidden (k) axis
    k = pl.program_id(1)

    @pl.when(k == 0)
    def _init():
        o_ref[...] = jnp.zeros_like(o_ref)

    x = x_ref[...].astype(w13_ref.dtype)          # in-kernel cast (VPU filler under MXU)
    x13 = jnp.dot(x, w13_ref[...], preferred_element_type=jnp.float32)  # (tm, 2*th) f32
    x1 = x13[:, :th]                              # static, 128-aligned slices
    x3 = x13[:, th:]
    h = (x1 * jax.nn.sigmoid(x1)) * x3            # SwiGLU in f32 (VPU + EUP)
    o_ref[...] += jnp.dot(h.astype(w2_ref.dtype), w2_ref[...],
                          preferred_element_type=jnp.float32)


def _ffn_kernel_scratch_out(x_ref, w13_ref, w2_ref, o_ref, acc_ref, *, th):
    """Non-f32-output variant: f32 VMEM scratch accumulator, cast at the last k step."""
    k = pl.program_id(1)

    @pl.when(k == 0)
    def _init():
        acc_ref[...] = jnp.zeros_like(acc_ref)

    x = x_ref[...].astype(w13_ref.dtype)
    x13 = jnp.dot(x, w13_ref[...], preferred_element_type=jnp.float32)
    x1 = x13[:, :th]
    x3 = x13[:, th:]
    h = (x1 * jax.nn.sigmoid(x1)) * x3
    acc_ref[...] += jnp.dot(h.astype(w2_ref.dtype), w2_ref[...],
                            preferred_element_type=jnp.float32)

    @pl.when(k == pl.num_programs(1) - 1)
    def _finalize():
        o_ref[...] = acc_ref[...].astype(o_ref.dtype)


# ----------------------------- planning / prep --------------------------------


def _round_up(x, m):
    return ((x + m - 1) // m) * m


def _vmem_capacity_bytes():
    try:
        info = pltpu.get_tpu_info()
        cap = getattr(info, "vmem_capacity_bytes", None)
        if cap:
            return int(cap)
    except Exception:
        pass
    return 64 << 20  # conservative fallback (v7x per-TC VMEM)


def _largest_hidden_tile(hidden_p, desired):
    """Largest 128-aligned divisor of hidden_p that is <= desired (>= 128)."""
    th = max(128, min((desired // 128) * 128, hidden_p))
    while hidden_p % th != 0:
        th -= 128
    return th


def _plan_vmem_bytes(tm, th, dim, x_itemsize, out_itemsize, use_scratch):
    bf16 = 2
    x_b = 2 * tm * dim * x_itemsize          # double-buffered activation block (f32 in VMEM)
    w13_b = 2 * dim * (2 * th) * bf16        # fused [W1 | W3] tile
    w2_b = 2 * th * dim * bf16
    o_b = 2 * tm * dim * out_itemsize
    acc_b = tm * dim * 4 if use_scratch else 0
    return x_b + w13_b + w2_b + o_b + acc_b


def plan_ffn_tiles(dim, hidden_p, *, max_tokens, x_itemsize, out_itemsize,
                   use_scratch, token_tile=None, hidden_tile=None):
    """Generation-aware tile plan. Returns (tm, th, vmem_limit_bytes)."""
    cap = _vmem_capacity_bytes()
    budget = (cap * 3) // 4                  # leave headroom for compiler-internal scratch
    if token_tile is None:
        token_tile = 1024 if cap >= (96 << 20) else 512   # v5e/v6e vs v7x
    if hidden_tile is None:
        hidden_tile = 512 if cap >= (96 << 20) else 256

    tm = max(16, min(_round_up(token_tile, 16), _round_up(max_tokens, 16)))
    th = _largest_hidden_tile(hidden_p, hidden_tile)

    # Shrink th first (weight tiles are re-streamed per token tile, so tm is the
    # arithmetic-intensity knob), then tm, until the plan fits the VMEM budget.
    while (_plan_vmem_bytes(tm, th, dim, x_itemsize, out_itemsize, use_scratch) > budget
           and th > 128):
        th = _largest_hidden_tile(hidden_p, th - 128)
    while (_plan_vmem_bytes(tm, th, dim, x_itemsize, out_itemsize, use_scratch) > budget
           and tm > 16):
        tm = max(16, _round_up(tm // 2, 16))

    need = _plan_vmem_bytes(tm, th, dim, x_itemsize, out_itemsize, use_scratch)
    vmem_limit = int(min(max(need + (8 << 20), 32 << 20), int(cap * 0.9)))
    return tm, th, vmem_limit


def prep_ffn_weights(w13, w2, hidden_tile, dtype=jnp.bfloat16):
    """One-time weight preparation (do at model init, NOT per forward call).

    w13: (2*hidden, dim) fused [W1; W3] in nn.Linear (out, in) layout.
    w2:  (dim, hidden)   in nn.Linear (out, in) layout.

    Zero-pads hidden to a multiple of 128 (mathematically exact), transposes to (in, out),
    casts to `dtype`, and interleaves W1/W3 per hidden tile so the kernel fetches ONE fused
    (dim, 2*th) block and issues a single MXU dot per grid step.
    Returns (w13_fused (dim, 2*hidden_p), w2_t (hidden_p, dim)).
    """
    two_h, dim = w13.shape
    hidden = two_h // 2
    hidden_p = _round_up(hidden, 128)
    pad = hidden_p - hidden
    assert hidden_p % hidden_tile == 0, (hidden_p, hidden_tile)

    w1 = w13[:hidden]
    w3 = w13[hidden:]
    if pad:
        zcol = jnp.zeros((pad, dim), w13.dtype)
        w1 = jnp.concatenate([w1, zcol], axis=0)
        w3 = jnp.concatenate([w3, zcol], axis=0)
        w2 = jnp.concatenate([w2, jnp.zeros((dim, pad), w2.dtype)], axis=1)

    nk = hidden_p // hidden_tile
    w1_t = jnp.asarray(w1.T, dtype=dtype)            # (dim, hidden_p)
    w3_t = jnp.asarray(w3.T, dtype=dtype)
    w13_f = jnp.stack(
        [w1_t.reshape(dim, nk, hidden_tile), w3_t.reshape(dim, nk, hidden_tile)],
        axis=2,
    ).reshape(dim, 2 * hidden_p)                      # per tile k: [ W1_k | W3_k ]
    w2_t = jnp.asarray(w2.T, dtype=dtype)             # (hidden_p, dim)
    return w13_f, w2_t


# ----------------------------- wrapper ---------------------------------------


def feed_forward_pallas(x, w13_f, w2_t, *, hidden_tile, token_tile, vmem_limit):
    """x: (..., dim). w13_f: (dim, 2*hidden_p) bf16 (tile-interleaved). w2_t: (hidden_p, dim) bf16."""
    orig_shape = x.shape
    dim = orig_shape[-1]
    hidden_p = w2_t.shape[0]
    th = hidden_tile
    assert w13_f.shape == (dim, 2 * hidden_p)
    assert w2_t.shape == (hidden_p, dim)
    assert hidden_p % th == 0

    x2d = x.reshape(-1, dim)                          # NO wrapper-side dtype cast
    T = x2d.shape[0]
    out_dtype = x.dtype

    tm = max(16, min(_round_up(token_tile, 16), _round_up(T, 16)))
    grid = (pl.cdiv(T, tm), hidden_p // th)           # reduction (hidden) axis last

    use_scratch = out_dtype != jnp.float32
    if use_scratch:
        kernel = functools.partial(_ffn_kernel_scratch_out, th=th)
        scratch = [pltpu.VMEM((tm, dim), jnp.float32)]
    else:
        kernel = functools.partial(_ffn_kernel_accum_out, th=th)
        scratch = []

    x_isz = jnp.dtype(x.dtype).itemsize
    w_isz = jnp.dtype(w13_f.dtype).itemsize
    o_isz = jnp.dtype(out_dtype).itemsize
    n_token_tiles = -(-T // tm)
    cost = pl.CostEstimate(
        flops=6 * T * dim * hidden_p,                 # x@W1, x@W3, h@W2
        transcendentals=T * hidden_p,                 # sigmoid
        bytes_accessed=(T * dim * x_isz
                        + 3 * dim * hidden_p * w_isz * n_token_tiles  # weights re-streamed
                        + T * dim * o_isz),
    )

    out2d = pl.pallas_call(
        kernel,
        out_shape=jax.ShapeDtypeStruct((T, dim), out_dtype),
        grid_spec=pltpu.PrefetchScalarGridSpec(
            num_scalar_prefetch=0,
            grid=grid,
            in_specs=[
                pl.BlockSpec((tm, dim), lambda i, k: (i, 0)),       # x tile (resident over k)
                pl.BlockSpec((dim, 2 * th), lambda i, k: (0, k)),   # fused [W1_k | W3_k]
                pl.BlockSpec((th, dim), lambda i, k: (k, 0)),       # W2_k
            ],
            out_specs=pl.BlockSpec((tm, dim), lambda i, k: (i, 0)),  # resident over k
            scratch_shapes=scratch,
        ),
        compiler_params=pltpu.CompilerParams(
            dimension_semantics=("parallel", "arbitrary"),
            vmem_limit_bytes=int(vmem_limit),
        ),
        cost_estimate=cost,
    )(x2d, w13_f, w2_t)

    # TODO(synk): mp_utils.all_reduce is the identity for mp_size == 1 (single device).
    return out2d.reshape(orig_shape)


def make_feed_forward(w13, w2, *, max_tokens=4096, token_tile=None, hidden_tile=None,
                      weight_dtype=jnp.bfloat16, x_dtype=jnp.float32):
    """One-time tile plan + weight prep; returns ffn(x) implementing FeedForward.forward."""
    two_h, dim = w13.shape
    hidden_p = _round_up(two_h // 2, 128)
    out_dtype = x_dtype
    use_scratch = out_dtype != jnp.float32
    tm, th, vmem_limit = plan_ffn_tiles(
        dim, hidden_p, max_tokens=max_tokens,
        x_itemsize=jnp.dtype(x_dtype).itemsize,
        out_itemsize=jnp.dtype(out_dtype).itemsize,
        use_scratch=use_scratch, token_tile=token_tile, hidden_tile=hidden_tile)
    w13_f, w2_t = prep_ffn_weights(w13, w2, th, dtype=weight_dtype)

    def ffn(x):
        return feed_forward_pallas(x, w13_f, w2_t, hidden_tile=th,
                                   token_tile=tm, vmem_limit=vmem_limit)

    return ffn


# ----------------------------- references / demo -----------------------------


def _compute_hidden_dim(dim, hidden_dim, multiple_of, ffn_dim_multiplier):
    hidden_dim = int(2 * hidden_dim / 3)
    if ffn_dim_multiplier is not None:
        hidden_dim = int(ffn_dim_multiplier * hidden_dim)
    hidden_dim = multiple_of * ((hidden_dim + multiple_of - 1) // multiple_of)
    return hidden_dim


def _reference_f32(x, w13, w2):
    x13 = x @ w13.T
    hidden = w13.shape[0] // 2
    x1, x3 = x13[..., :hidden], x13[..., hidden:]
    return (jax.nn.silu(x1) * x3) @ w2.T


def _reference_bf16(x, w13, w2):
    # Mirrors the kernel's arithmetic (bf16 MXU operands, f32 accumulation, f32 SwiGLU).
    hidden = w13.shape[0] // 2
    xb = x.astype(jnp.bfloat16)
    w1 = w13[:hidden].T.astype(jnp.bfloat16)
    w3 = w13[hidden:].T.astype(jnp.bfloat16)
    w2b = w2.T.astype(jnp.bfloat16)
    x1 = jnp.dot(xb, w1, preferred_element_type=jnp.float32)
    x3 = jnp.dot(xb, w3, preferred_element_type=jnp.float32)
    h = (x1 * jax.nn.sigmoid(x1)) * x3
    return jnp.dot(h.astype(jnp.bfloat16), w2b, preferred_element_type=jnp.float32)


if __name__ == "__main__":
    # Module hyperparameters (mp_size = 1); small but 128-aligned like real models.
    dim = 256
    hidden_dim_arg = 4 * dim          # 1024
    multiple_of = 128
    ffn_dim_multiplier = None
    hidden = _compute_hidden_dim(dim, hidden_dim_arg, multiple_of,
                                 ffn_dim_multiplier)   # -> 768

    batch, seq = 2, 16

    key = jax.random.PRNGKey(0)
    kx, k13, k2 = jax.random.split(key, 3)

    x = jax.random.normal(kx, (batch, seq, dim), dtype=jnp.float32)
    # nn.Linear weight layout: (out_features, in_features), no bias.
    w13 = jax.random.normal(k13, (2 * hidden, dim), dtype=jnp.float32) * 0.05
    w2 = jax.random.normal(k2, (dim, hidden), dtype=jnp.float32) * 0.05

    # One-time plan + weight prep. Small explicit tiles so the demo grid is (2, 3).
    ffn = make_feed_forward(w13, w2, max_tokens=batch * seq,
                            token_tile=16, hidden_tile=256, x_dtype=x.dtype)

    out = jax.block_until_ready(ffn(x))

    ref_bf16 = _reference_bf16(x, w13, w2)
    ref_f32 = _reference_f32(x, w13, w2)
    assert out.shape == ref_f32.shape == (batch, seq, dim)
    assert out.dtype == x.dtype
    assert jnp.allclose(out, ref_bf16, atol=4e-3, rtol=4e-3), "mismatch vs bf16 reference"
    assert jnp.allclose(out, ref_f32, atol=5e-2, rtol=5e-2), "mismatch vs f32 reference"

    print("KERNEL_OK")
</pallas_src>

<mosaic_0001>
module attributes {stable_mosaic.version = 11 : i64} {
  func.func @_ffn_kernel_accum_out(%arg0: i32, %arg1: i32, %arg2: memref<16x256xf32, #tpu.memory_space<vmem>>, %arg3: memref<256x512xbf16, #tpu.memory_space<vmem>>, %arg4: memref<256x256xbf16, #tpu.memory_space<vmem>>, %arg5: memref<16x256xf32, #tpu.memory_space<vmem>>) attributes {dimension_semantics = [#tpu.dimension_semantics<parallel>, #tpu.dimension_semantics<arbitrary>], iteration_bounds = array<i64: 2, 3>, scalar_prefetch = 0 : i64, scratch_operands = 0 : i64, tpu.core_type = #tpu.core_type<tc>, window_params = [{transform_indices = @transform_0, window_bounds = array<i64: 16, 256>}, {transform_indices = @transform_1, window_bounds = array<i64: 256, 512>}, {transform_indices = @transform_2, window_bounds = array<i64: 256, 256>}, {transform_indices = @transform_3, window_bounds = array<i64: 16, 256>}]} {
    %c0_i32 = arith.constant 0 : i32
    %0 = arith.cmpi eq, %arg1, %c0_i32 : i32
    %1 = arith.extui %0 : i1 to i32
    %c0_i32_0 = arith.constant 0 : i32
    %2 = arith.cmpi ne, %1, %c0_i32_0 : i32
    scf.if %2 {
      %cst_12 = arith.constant 0.000000e+00 : f32
      %22 = vector.broadcast %cst_12 : f32 to vector<16x256xf32>
      %c0_13 = arith.constant 0 : index
      %c0_14 = arith.constant 0 : index
      %23 = vector.load %arg5[%c0_13, %c0_14] : memref<16x256xf32, #tpu.memory_space<vmem>>, vector<16x256xf32>
      tpu.vector_store %arg5[%c0_13, %c0_14], %22 {strides = array<i32>} : memref<16x256xf32, #tpu.memory_space<vmem>>, vector<16x256xf32>,
    } else {
    }
    %c0 = arith.constant 0 : index
    %c0_1 = arith.constant 0 : index
    %3 = vector.load %arg2[%c0, %c0_1] : memref<16x256xf32, #tpu.memory_space<vmem>>, vector<16x256xf32>
    %4 = arith.truncf %3 : vector<16x256xf32> to vector<16x256xbf16>
    %c0_2 = arith.constant 0 : index
    %c0_3 = arith.constant 0 : index
    %5 = vector.load %arg3[%c0_2, %c0_3] : memref<256x512xbf16, #tpu.memory_space<vmem>>, vector<256x512xbf16>
    %cst = arith.constant dense<0.000000e+00> : vector<16x512xf32>
    %6 = tpu.matmul %4, %5, %cst {dimension_numbers = #tpu.dot_dimension_numbers<[1], [0], [0], [1], [0, 0, 1, 1], [], []>} : vector<16x256xbf16>, vector<256x512xbf16>, vector<16x512xf32> -> vector<16x512xf32>
    %7 = vector.extract_strided_slice %6 {offsets = [0, 0], sizes = [16, 256], strides = [1, 1]} : vector<16x512xf32> to vector<16x256xf32>
    %8 = vector.extract_strided_slice %6 {offsets = [0, 256], sizes = [16, 256], strides = [1, 1]} : vector<16x512xf32> to vector<16x256xf32>
    %9 = arith.negf %7 : vector<16x256xf32>
    %10 = math.exp %9 : vector<16x256xf32>
    %cst_4 = arith.constant 1.000000e+00 : f32
    %11 = vector.broadcast %cst_4 : f32 to vector<16x256xf32>
    %12 = arith.addf %11, %10 : vector<16x256xf32>
    %13 = arith.divf %11, %12 : vector<16x256xf32>
    %14 = arith.mulf %7, %13 : vector<16x256xf32>
    %15 = arith.mulf %14, %8 : vector<16x256xf32>
    %c0_5 = arith.constant 0 : index
    %c0_6 = arith.constant 0 : index
    %16 = vector.load %arg5[%c0_5, %c0_6] : memref<16x256xf32, #tpu.memory_space<vmem>>, vector<16x256xf32>
    %17 = arith.truncf %15 : vector<16x256xf32> to vector<16x256xbf16>
    %c0_7 = arith.constant 0 : index
    %c0_8 = arith.constant 0 : index
    %18 = vector.load %arg4[%c0_7, %c0_8] : memref<256x256xbf16, #tpu.memory_space<vmem>>, vector<256x256xbf16>
    %cst_9 = arith.constant dense<0.000000e+00> : vector<16x256xf32>
    %19 = tpu.matmul %17, %18, %cst_9 {dimension_numbers = #tpu.dot_dimension_numbers<[1], [0], [0], [1], [0, 0, 1, 1], [], []>} : vector<16x256xbf16>, vector<256x256xbf16>, vector<16x256xf32> -> vector<16x256xf32>
    %20 = arith.addf %16, %19 : vector<16x256xf32>
    %c0_10 = arith.constant 0 : index
    %c0_11 = arith.constant 0 : index
    %21 = vector.load %arg5[%c0_10, %c0_11] : memref<16x256xf32, #tpu.memory_space<vmem>>, vector<16x256xf32>
    tpu.vector_store %arg5[%c0_10, %c0_11], %20 {strides = array<i32>} : memref<16x256xf32, #tpu.memory_space<vmem>>, vector<16x256xf32>,
    return
  }
  func.func @transform_0(%arg0: i32, %arg1: i32) -> (i32, i32) {
    %c0_i32 = arith.constant 0 : i32
    %c0_i32_0 = arith.constant 0 : i32
    return %arg0, %c0_i32 : i32, i32
  }
  func.func @transform_1(%arg0: i32, %arg1: i32) -> (i32, i32) {
    %c0_i32 = arith.constant 0 : i32
    %c0_i32_0 = arith.constant 0 : i32
    return %c0_i32, %arg1 : i32, i32
  }
  func.func @transform_2(%arg0: i32, %arg1: i32) -> (i32, i32) {
    %c0_i32 = arith.constant 0 : i32
    %c0_i32_0 = arith.constant 0 : i32
    return %arg1, %c0_i32 : i32, i32
  }
  func.func @transform_3(%arg0: i32, %arg1: i32) -> (i32, i32) {
    %c0_i32 = arith.constant 0 : i32
    %c0_i32_0 = arith.constant 0 : i32
    return %arg0, %c0_i32 : i32, i32
  }
}

</mosaic_0001>

<bundles_post_ra>
// kernel: tpu_custom_call.1
= control target key start
LH: loop header
LB: loop body
LE: loop exit
PB: predicated region body
PF: predicated region fallthrough
CT: control target
= control target key end

     0   :  { %s2710_s0 = inlined_call_operand.hbm [shape: f32[32,256], index: 0, kind: input, shape index: {}]   ;;  %s2711_s1 = inlined_call_operand.hbm [shape: bf16[256,1536], index: 1, kind: input, shape index: {}]   ;;  %s2712_s2 = inlined_call_operand.hbm [shape: bf16[768,256], index: 2, kind: input, shape index: {}]   ;;  %s2713_s3 = inlined_call_operand.hbm [shape: f32[32,256], index: 3, kind: output, shape index: {}]  }
   0x1   :  { %2725 = sst [smem:[#allocation21_spill]] %s2710_s0 }
   0x2   :  { %2726 = sst [smem:[#allocation22_spill]] %s2711_s1 }
   0x3   :  { %2727 = sst [smem:[#allocation23_spill]] %s2713_s3 }
   0x4   :  { %8 = vsyncpa [#allocation3], 0 }
   0x5   :  { %10 = vsyncpa [#allocation3 + $0x1], 0 }
   0x6   :  { %11 = vsyncpa [#allocation6], 0 }
   0x7   :  { %13 = vsyncpa [#allocation6 + $0x1], 0 }
   0x8   :  { %14 = vsyncpa [#allocation4], 0 }
   0x9   :  { %16 = vsyncpa [#allocation4 + $0x1], 0  ;;  %s2190_s12 = smov 0   ;;  %s2192_s13 = smov 0  }
   0xa   :  { %s2194_s14 = smov 0   ;;  %s2196_s15 = smov 0  }
   0xb   :  { %s2198_s16 = smov 0   ;;  %s2200_s17 = smov 0  }
   0xc   :  { %s2202_s18 = smov 0   ;;  %s2204_s19 = smov 0  }
   0xd   :  { %s2206_s20 = smov 0   ;;  %s2208_s21 = smov 0  }
   0xe   :  { %s2210_s22 = smov 0  }
   0xf LB: > { %2728 = sst [smem:[#allocation12_spill]] %s2140_s17  ;;  %s31_s23 = sadd.s32 1, %s2152_s20  ;;  %s2160_s22 = sphi %s2210_s22, %s22_s22   ;;  %s2156_s21 = sphi %s2208_s21, %s2762_s21   ;;  %s2152_s20 = sphi %s2206_s20, %s2769_s20   ;;  %s2148_s19 = sphi %s2204_s19, %s2760_s19   ;;  %s2144_s18 = sphi %s2202_s18, %s2768_s18   ;;  %s2140_s17 = sphi %s2200_s17, %s2759_s17   ;;  %s2136_s16 = sphi %s2198_s16, %s2767_s16   ;;  %s2132_s15 = sphi %s2196_s15, %s2766_s15   ;;  %s2128_s14 = sphi %s2194_s14, %s2765_s14   ;;  %s2124_s13 = sphi %s2192_s13, %s2764_s13   ;;  %s2120_s12 = sphi %s2190_s12, %s2763_s12  }
  0x10   : > { %2729 = sst [smem:[#allocation13_spill]] %s2148_s19  ;;  %p49_p0 = scmp.eq.s32.totalorder %s2160_s22, 0 }
  0x11   : > { %2730 = sst [smem:[#allocation14_spill]] %s2156_s21  ;;  %p2247_p1 = scmp.ge.s32.totalorder %s31_s23, 3 }
  0x12   : > { %s67_s25 = sadd.s32 1, %s2128_s14  ;;  %p74_p2 = scmp.ne.s32.totalorder %s2128_s14, %s2124_s13 }
  0x13   : > { %p80_p3 = scmp.ne.s32.totalorder %s2124_s13, %s2120_s12  ;;  %s2771_s23 = smov (%p2247_p1, %s31_s23), 0 }
  0x14   : > { %2732 = sst [smem:[#allocation15_spill]] %s2771_s23  ;;  %p2262_p4 = por %p74_p2, %p49_p0 }
  0x15   : > { %s64_s27 = ssub.s32 %s2152_s20, %s2771_s23  ;;  %p1830_p5 = scmp.lt.s32.totalorder %s2160_s22, 6 }
  0x16   : > { %p65_p6 = scmp.eq.s32.totalorder %s64_s27, 0  ;;  %s179_s28 = sand.u32 1, %s2160_s22  }
  0x17   : > { %s2716_s30 = sand.u32 1, %s2128_s14   ;;  %s1707_s5 = sshll.u32 %s2152_s20, 4 }
  0x18   : > { %s2271_s29 = scalar_select %p65_p6, %s2128_s14, %s67_s25  }
  0x19   : > { %s1298_s4 = sshll.u32 %s2716_s30, 9  ;;  %s2735_s1 = sld [smem:[#allocation22_spill]] }
  0x1a   : > { %2734 = sst [smem:[#allocation16_spill]] %s2271_s29  ;;  %s183_s10 = scalar_lea.vmem [#allocation5], %s1298_s4 }
  0x1b   : > { %s191_s11 = sshll.u32 %s183_s10, 4  ;;  %p2284_p7 = pnand %p1830_p5, %p2262_p4  ;;  %s192_s11 = int_to_ptr.vmem [resolvable:$true] %s191_s11 }
  0x1c   : > { %p1305_p8 = scmp.ge.s32.totalorder %s2160_s22, 1  ;;  %p222_p9 = scmp.lt.s32.totalorder %s2160_s22, 7 }
  0x1d   : > { %s2290_s27 = scalar_lea.sflag [#allocation6], %s179_s28  ;;  %s2162_s4 = smov 768  }
  0x1e   : > { %s2715_s6 = smov 16   ;;  %p2297_p10 = pnand %p1305_p8, %p222_p9 }
  0x1f   : > { %s188_s8 = scalar_lea.hbm %s2735_s1, %s1707_s5  ;;  %s2714_s5 = smov 256  }
  0x20   : > { %s189_s9 = sshll.u32 %s188_s8, 4  ;;  %s2302_s7 = sadd.s32 4294967295, %s2160_s22   ;;  %s190_s9 = int_to_ptr.hbm [resolvable:$true] %s189_s9 }
  0x21   : > { %1822 = dma.hbm_to_vmem [thread:$0]  (!%p2284_p7), %s190_s9, 8192, %s192_s11, %s2290_s27, %s2162_s4, %s2714_s5, %s2715_s6  }
  0x22   : > { %s1291_s28 = sadd.s32 4294967294, %s2160_s22   ;;  %s34_s8 = sadd.s32 1, %s2156_s21 }
  0x23   : > { %s41_s10 = sadd.s32 1, %s2140_s17  ;;  %s2773_s8 = smov (!%p2247_p1, %s34_s8), %s2156_s21 }
  0x24   : > { %p48_p11 = scmp.ne.s32.totalorder %s2140_s17, %s2136_s16  ;;  %p54_p12 = scmp.ne.s32.totalorder %s2136_s16, %s2132_s15 }
  0x25   : > { %p36_p13 = scmp.ge.s32.totalorder %s2773_s8, 2  ;;  %p55_p2 = scmp.eq.s32.totalorder %s2302_s7, 0 }
  0x26   : > { %p2317_p4 = por %p49_p0, %p48_p11  ;;  %p130_p6 = scmp.eq.s32.totalorder %s2302_s7, 5 }
  0x27   : > { %s2775_s8 = smov (%p36_p13, %s2773_s8), 0  ;;  %p2327_p8 = por %p55_p2, %p54_p12 }
  0x28   : > { %2739 = sst [smem:[#allocation17_spill]] %s2775_s8  ;;  %p2334_p1 = por %p80_p3, %p55_p2 }
  0x29   : > { %s38_s4 = ssub.s32 %s2156_s21, %s2775_s8  ;;  %p2340_p0 = por %p130_p6, %p48_p11 }
  0x2a   : > { %p39_p9 = scmp.eq.s32.totalorder %s38_s4, 0  ;;  %p136_p13 = scmp.eq.s32.totalorder %s1291_s28, 5 }
  0x2b   : > { %s2742_s5 = scalar_select %p2340_p0, 1, 0 }
  0x2c   : > { %s156_s6 = sand.u32 1, %s2140_s17   ;;  %s1706_s30 = sshll.u32 %s2156_s21, 5 }
  0x2d   : > { %2743 = sst [smem:[#allocation18_spill]] %s2742_s5  ;;  %p2352_p3 = por %p136_p13, %p54_p12 }
  0x2e   : > { %s2347_s1 = scalar_select %p39_p9, %s2140_s17, %s41_s10  }
  0x2f   : > { %s2745_s12 = scalar_select %p2352_p3, 1, 0 }
  0x30   : > { %2744 = sst [smem:[#allocation19_spill]] %s2347_s1  ;;  %s1294_s23 = sshll.u32 %s156_s6, 5 }
  0x31   : > { %2746 = sst [smem:[#allocation20_spill]] %s2745_s12  ;;  %s160_s5 = scalar_lea.vmem [#allocation2], %s1294_s23 }
  0x32   : > { %s2747_s0 = sld [smem:[#allocation21_spill]]  ;;  %s169_s28 = sshll.u32 %s160_s5, 4  ;;  %s170_s28 = int_to_ptr.vmem [resolvable:$true] %s169_s28 }
  0x33   : > { %p1817_p11 = pnand %p1830_p5, %p2317_p4  ;;  %s2748_s10 = sand.u32 1, %s2128_s14  }
  0x34   : > { %s1301_s4 = sshll.u32 %s2748_s10, 8  ;;  %s1709_s21 = sshll.u32 %s2152_s20, 8 }
  0x35   : > { %s157_s1 = scalar_lea.sflag [#allocation3], %s156_s6  ;;  %s2749_s17 = smov 16  }
  0x36   : > { %s2750_s12 = smov 256   ;;  %s205_s23 = scalar_lea.vmem [#allocation7], %s1301_s4 }
  0x37   : > { %s214_s8 = sshll.u32 %s205_s23, 4  ;;  %s2165_s5 = smov 128   ;;  %s215_s8 = int_to_ptr.vmem [resolvable:$true] %s214_s8 }
  0x38   : > { %s166_s3 = scalar_lea.hbm %s2747_s0, %s1706_s30  ;;  %s2166_s9 = smov 8  }
  0x39   : > { %s167_s19 = sshll.u32 %s166_s3, 4  ;;  %s211_s3 = scalar_lea.hbm %s2712_s2, %s1709_s21  ;;  %s168_s19 = int_to_ptr.hbm [resolvable:$true] %s167_s19 }
  0x3a   : > { %1819 = dma.hbm_to_vmem [thread:$0]  (!%p1817_p11), %s168_s19, 512, %s170_s28, %s157_s1, %s2750_s12, %s2750_s12, %s2749_s17  }
  0x3b   : > { %s212_s0 = sshll.u32 %s211_s3, 4  ;;  %226 = sbr.rel (%p2297_p10) target bundleno = 444 (0x1bc), region = 32  ;;  %s213_s0 = int_to_ptr.hbm [resolvable:$true] %s212_s0 }
  0x3c   : > { %1825 = dma.hbm_to_vmem [thread:$0]  (!%p2284_p7), %s213_s0, 4096, %s215_s8, %s2290_s27, %s2165_s5, %s2165_s5, %s2166_s9  }
  0x3d   : > { %s2378_s6 = sand.u32 (!%p2297_p10), 1, %s2136_s16  }
  0x3e   : > { %s1306_s1 = sshll.u32 (!%p2297_p10), %s2378_s6, 5  ;;  %s229_s17 = scalar_lea.sflag (!%p2297_p10), [#allocation3], %s2378_s6 }
  0x3f   : > { %s2382_s19 = scalar_lea.vmem (!%p2297_p10), [#allocation2], %s1306_s1 }
  0x40   : > { %2107 = dma.done.wait (%p2327_p8), %s229_s17, 512  }
  0x41   : > { %2109 = vsyncadd (%p2327_p8), %s229_s17, 4294966784  ;;  %s238_s0 = sand.u32 1, %s2302_s7   ;;  %s240_s21 = sand.u32 1, %s2124_s13  }
  0x42   : > { %s1307_s25 = sshll.u32 %s240_s21, 9  ;;  %s239_s27 = scalar_lea.sflag [#allocation6], %s238_s0 }
  0x43   : > { %s2390_s26 = scalar_lea.vmem [#allocation5], %s1307_s25 }
  0x44   : > { %2111 = dma.done.wait (%p2334_p1), %s239_s27, 12288  }
  0x45   : > { %2113 = vsyncadd (%p2334_p1), %s239_s27, 4294955008  ;;  %s1308_s12 = sshll.u32 %s240_s21, 8  ;;  %s2398_s10 = scalar_lea.vmem [#allocation8], %s1306_s1 }
  0x46   : > { %s2396_s28 = scalar_lea.vmem [#allocation7], %s1308_s12  ;;  %p1310_p5 = scmp.ne.s32.totalorder %s2144_s18, 0 }
  0x48   : > { %293 = sbr.rel (%p1310_p5) target bundleno = 82 (0x52), region = 48 }
  0x4d   : > { %v2167_v0 = vmov 0.0  }
  0x4e   : > { %294 = vst [vmem:[%s2398_s10] sm:$0xff] %v2167_v0 }
  0x4f   : > { %295 = vst [vmem:[%s2398_s10 + $0x8] sm:$0xff] %v2167_v0 }
  0x50   : > { %296 = vst [vmem:[%s2398_s10 + $0x10] sm:$0xff] %v2167_v0 }
  0x51   : > { %297 = vst [vmem:[%s2398_s10 + $0x18] sm:$0xff] %v2167_v0 }
  0x52 PF: > { %v1425_v1 = vld [vmem:[%s2390_s26 + $0xe0] sm:$0xf]  ;;  %v1740_v2 = vld [vmem:[%s2390_s26 + $0xec] sm:$0xf0]  ;;  %v1738_v6 = vld [vmem:[%s2390_s26 + $0xe4] sm:$0xf] }
  0x53   : > { %v1553_v3 = vld [vmem:[%s2390_s26 + $0x1e0] sm:$0xf]  ;;  %v1426_v4 = vor.u32 %v1740_v2, %v1425_v1  ;;  %v1772_v5 = vld [vmem:[%s2390_s26 + $0x1ec] sm:$0xf0]  ;;  %v1427_v7 = vld [vmem:[%s2390_s26 + $0xf0] sm:$0xf0] }
  0x54   : > { %v1554_v8 = vor.u32 %v1772_v5, %v1553_v3  ;;  %v1430_v9 = vor.u32 %v1738_v6, %v1427_v7  ;;  %v1770_v10 = vld [vmem:[%s2390_s26 + $0x1e4] sm:$0xf]  ;;  %v1555_v11 = vld [vmem:[%s2390_s26 + $0x1f0] sm:$0xf0]  ;;  %v1409_v12 = vld [vmem:[%s2390_s26 + $0xc0] sm:$0xf] }
  0x55   : > { %688 = vmatpush.bf16.msra.mxu0 %v1426_v4  ;;  %v1558_v13 = vor.u32 %v1770_v10, %v1555_v11  ;;  %v1736_v14 = vld [vmem:[%s2390_s26 + $0xcc] sm:$0xf0]  ;;  %v1537_v15 = vld [vmem:[%s2390_s26 + $0x1c0] sm:$0xf]  ;;  %v1734_v19 = vld [vmem:[%s2390_s26 + $0xc4] sm:$0xf] }
  0x56   : > { %v1768_v16 = vld [vmem:[%s2390_s26 + $0x1cc] sm:$0xf0]  ;;  %702 = vmatpush.bf16.msra.mxu1 %v1554_v8  ;;  %716 = vmatpush.bf16.msra.mxu2 %v1430_v9  ;;  %v1410_v17 = vor.u32 %v1736_v14, %v1409_v12  ;;  %v1411_v20 = vld [vmem:[%s2390_s26 + $0xd0] sm:$0xf0]  ;;  %v1766_v21 = vld [vmem:[%s2390_s26 + $0x1c4] sm:$0xf] }
  0x57   : > { %v1538_v18 = vor.u32 %v1768_v16, %v1537_v15  ;;  %730 = vmatpush.bf16.msra.mxu3 %v1558_v13  ;;  %v1414_v22 = vor.u32 %v1734_v19, %v1411_v20  ;;  %v1539_v23 = vld [vmem:[%s2390_s26 + $0x1d0] sm:$0xf0]  ;;  %v1393_v24 = vld [vmem:[%s2390_s26 + $0xa0] sm:$0xf]  ;;  %v1732_v25 = vld [vmem:[%s2390_s26 + $0xac] sm:$0xf0] }
  0x58   : > { %v1542_v26 = vor.u32 %v1766_v21, %v1539_v23  ;;  %v1521_v27 = vld [vmem:[%s2390_s26 + $0x1a0] sm:$0xf]  ;;  %v1764_v28 = vld [vmem:[%s2390_s26 + $0x1ac] sm:$0xf0]  ;;  %v1730_v29 = vld [vmem:[%s2390_s26 + $0xa4] sm:$0xf]  ;;  %v1394_v30 = vor.u32 %v1732_v25, %v1393_v24 }
  0x59   : > { %689 = vmatpush.bf16.msra.mxu0 %v1410_v17  ;;  %v1395_v31 = vld [vmem:[%s2390_s26 + $0xb0] sm:$0xf0]  ;;  %v1762_v32 = vld [vmem:[%s2390_s26 + $0x1a4] sm:$0xf]  ;;  %v1522_v34 = vor.u32 %v1764_v28, %v1521_v27  ;;  %v1377_v36 = vld [vmem:[%s2390_s26 + $0x80] sm:$0xf] }
  0x5a   : > { %v1523_v33 = vld [vmem:[%s2390_s26 + $0x1b0] sm:$0xf0]  ;;  %703 = vmatpush.bf16.msra.mxu1 %v1538_v18  ;;  %717 = vmatpush.bf16.msra.mxu2 %v1414_v22  ;;  %v1398_v35 = vor.u32 %v1730_v29, %v1395_v31  ;;  %v1728_v37 = vld [vmem:[%s2390_s26 + $0x8c] sm:$0xf0]  ;;  %v1505_v38 = vld [vmem:[%s2390_s26 + $0x180] sm:$0xf] }
  0x5b   : > { %731 = vmatpush.bf16.msra.mxu3 %v1542_v26  ;;  %v1526_v39 = vor.u32 %v1762_v32, %v1523_v33  ;;  %v1760_v40 = vld [vmem:[%s2390_s26 + $0x18c] sm:$0xf0]  ;;  %v1726_v41 = vld [vmem:[%s2390_s26 + $0x84] sm:$0xf]  ;;  %v1379_v42 = vld [vmem:[%s2390_s26 + $0x90] sm:$0xf0]  ;;  %v1378_v45 = vor.u32 %v1728_v37, %v1377_v36 }
  0x5c   : > { %v1758_v43 = vld [vmem:[%s2390_s26 + $0x184] sm:$0xf]  ;;  %v1507_v44 = vld [vmem:[%s2390_s26 + $0x190] sm:$0xf0]  ;;  %v1506_v46 = vor.u32 %v1760_v40, %v1505_v38  ;;  %v1382_v47 = vor.u32 %v1726_v41, %v1379_v42  ;;  %v1361_v48 = vld [vmem:[%s2390_s26 + $0x60] sm:$0xf] }
  0x5d   : > { %690 = vmatpush.bf16.msra.mxu0 %v1394_v30  ;;  %v1724_v49 = vld [vmem:[%s2390_s26 + $0x6c] sm:$0xf0]  ;;  %v1489_v50 = vld [vmem:[%s2390_s26 + $0x160] sm:$0xf]  ;;  %v1510_v51 = vor.u32 %v1758_v43, %v1507_v44  ;;  %v1722_v53 = vld [vmem:[%s2390_s26 + $0x64] sm:$0xf] }
  0x5e   : > { %704 = vmatpush.bf16.msra.mxu1 %v1522_v34  ;;  %718 = vmatpush.bf16.msra.mxu2 %v1398_v35  ;;  %v1756_v52 = vld [vmem:[%s2390_s26 + $0x16c] sm:$0xf0]  ;;  %v1363_v54 = vld [vmem:[%s2390_s26 + $0x70] sm:$0xf0]  ;;  %v1754_v55 = vld [vmem:[%s2390_s26 + $0x164] sm:$0xf]  ;;  %v1362_v57 = vor.u32 %v1724_v49, %v1361_v48 }
  0x5f   : > { %732 = vmatpush.bf16.msra.mxu3 %v1526_v39  ;;  %v1491_v56 = vld [vmem:[%s2390_s26 + $0x170] sm:$0xf0]  ;;  %v1490_v58 = vor.u32 %v1756_v52, %v1489_v50  ;;  %v1366_v59 = vor.u32 %v1722_v53, %v1363_v54  ;;  %v1345_v60 = vld [vmem:[%s2390_s26 + $0x40] sm:$0xf]  ;;  %v1720_v61 = vld [vmem:[%s2390_s26 + $0x4c] sm:$0xf0] }
  0x60   : > { %v1473_v62 = vld [vmem:[%s2390_s26 + $0x140] sm:$0xf]  ;;  %v1494_v63 = vor.u32 %v1754_v55, %v1491_v56  ;;  %v1752_v0 = vld [vmem:[%s2390_s26 + $0x14c] sm:$0xf0]  ;;  %v1718_v1 = vld [vmem:[%s2390_s26 + $0x44] sm:$0xf]  ;;  %v1346_v5 = vor.u32 %v1720_v61, %v1345_v60 }
  0x61   : > { %691 = vmatpush.bf16.msra.mxu0 %v1378_v45  ;;  %v1347_v2 = vld [vmem:[%s2390_s26 + $0x50] sm:$0xf0]  ;;  %v1750_v3 = vld [vmem:[%s2390_s26 + $0x144] sm:$0xf]  ;;  %v1474_v6 = vor.u32 %v1752_v0, %v1473_v62  ;;  %v1329_v8 = vld [vmem:[%s2390_s26 + $0x20] sm:$0xf] }
  0x62   : > { %705 = vmatpush.bf16.msra.mxu1 %v1506_v46  ;;  %719 = vmatpush.bf16.msra.mxu2 %v1382_v47  ;;  %v1475_v4 = vld [vmem:[%s2390_s26 + $0x150] sm:$0xf0]  ;;  %v1350_v7 = vor.u32 %v1718_v1, %v1347_v2  ;;  %v1716_v9 = vld [vmem:[%s2390_s26 + $0x2c] sm:$0xf0]  ;;  %v1457_v10 = vld [vmem:[%s2390_s26 + $0x120] sm:$0xf] }
  0x63   : > { %733 = vmatpush.bf16.msra.mxu3 %v1510_v51  ;;  %v1478_v11 = vor.u32 %v1750_v3, %v1475_v4  ;;  %v1748_v12 = vld [vmem:[%s2390_s26 + $0x12c] sm:$0xf0]  ;;  %v1714_v13 = vld [vmem:[%s2390_s26 + $0x24] sm:$0xf]  ;;  %v1331_v14 = vld [vmem:[%s2390_s26 + $0x30] sm:$0xf0]  ;;  %v1330_v17 = vor.u32 %v1716_v9, %v1329_v8 }
  0x64   : > { %v1746_v15 = vld [vmem:[%s2390_s26 + $0x124] sm:$0xf]  ;;  %v1459_v16 = vld [vmem:[%s2390_s26 + $0x130] sm:$0xf0]  ;;  %v1313_v18 = vld [vmem:[%s2390_s26] sm:$0xf]  ;;  %v1458_v21 = vor.u32 %v1748_v12, %v1457_v10  ;;  %v1334_v22 = vor.u32 %v1714_v13, %v1331_v14 }
  0x65   : > { %692 = vmatpush.bf16.msra.mxu0 %v1362_v57  ;;  %v1712_v19 = vld [vmem:[%s2390_s26 + $0xc] sm:$0xf0]  ;;  %v1441_v20 = vld [vmem:[%s2390_s26 + $0x100] sm:$0xf]  ;;  %v1710_v24 = vld [vmem:[%s2390_s26 + $0x4] sm:$0xf]  ;;  %v1462_v26 = vor.u32 %v1746_v15, %v1459_v16 }
  0x66   : > { %706 = vmatpush.bf16.msra.mxu1 %v1490_v58  ;;  %720 = vmatpush.bf16.msra.mxu2 %v1366_v59  ;;  %v1744_v23 = vld [vmem:[%s2390_s26 + $0x10c] sm:$0xf0]  ;;  %v1315_v25 = vld [vmem:[%s2390_s26 + $0x10] sm:$0xf0]  ;;  %v1742_v27 = vld [vmem:[%s2390_s26 + $0x104] sm:$0xf]  ;;  %v1314_v33 = vor.u32 %v1712_v19, %v1313_v18 }
  0x67   : > { %734 = vmatpush.bf16.msra.mxu3 %v1494_v63  ;;  %v1443_v28 = vld [vmem:[%s2390_s26 + $0x110] sm:$0xf0]  ;;  %v1433_v29 = vld [vmem:[%s2390_s26 + $0xe8] sm:$0xf]  ;;  %v1741_v30 = vld [vmem:[%s2390_s26 + $0xf4] sm:$0xf0]  ;;  %v1442_v37 = vor.u32 %v1744_v23, %v1441_v20  ;;  %v1318_v38 = vor.u32 %v1710_v24, %v1315_v25 }
  0x68   : > { %v1561_v31 = vld [vmem:[%s2390_s26 + $0x1e8] sm:$0xf]  ;;  %v1773_v32 = vld [vmem:[%s2390_s26 + $0x1f4] sm:$0xf0]  ;;  %v1739_v34 = vld [vmem:[%s2390_s26 + $0xec] sm:$0xf]  ;;  %v1446_v42 = vor.u32 %v1742_v27, %v1443_v28  ;;  %v1434_v43 = vor.u32 %v1741_v30, %v1433_v29 }
  0x69   : > { %693 = vmatpush.bf16.msra.mxu0 %v1346_v5  ;;  %v1435_v35 = vld [vmem:[%s2390_s26 + $0xf8] sm:$0xf0]  ;;  %v1771_v36 = vld [vmem:[%s2390_s26 + $0x1ec] sm:$0xf]  ;;  %v298_v40 = vld [vmem:[%s2382_s19] sm:$0xff]  ;;  %v1562_v46 = vor.u32 %v1773_v32, %v1561_v31  ;;  %s2753_s18 = sld [smem:[#allocation13_spill]] }
  0x6a   : > { %707 = vmatpush.bf16.msra.mxu1 %v1474_v6  ;;  %721 = vmatpush.bf16.msra.mxu2 %v1350_v7  ;;  %v1563_v39 = vld [vmem:[%s2390_s26 + $0x1f8] sm:$0xf0]  ;;  %v300_v41 = vld [vmem:[%s2382_s19 + $0x10] sm:$0xff]  ;;  %v299_v44 = vld [vmem:[%s2382_s19 + $0x8] sm:$0xff]  ;;  %v1438_v47 = vor.u32 %v1739_v34, %v1435_v35  ;;  %s2754_s4 = sld [smem:[#allocation23_spill]]  ;;  %s1160_s3 = sshll.u32 %s2398_s10, 4  ;;  %s1161_s3 = int_to_ptr.vmem [resolvable:$true] %s1160_s3 }
  0x6b   : > { %735 = vmatpush.bf16.msra.mxu3 %v1478_v11  ;;  %v301_v45 = vld [vmem:[%s2382_s19 + $0x18] sm:$0xff]  ;;  %v1417_v48 = vld [vmem:[%s2390_s26 + $0xc8] sm:$0xf]  ;;  %v1566_v51 = vor.u32 %v1771_v36, %v1563_v39  ;;  %v2484_v52 = vpack.c.bf16 %v300_v41, %v298_v40  ;;  %v1735_v54 = vld [vmem:[%s2390_s26 + $0xcc] sm:$0xf]  ;;  %s1147_s8 = scalar_lea.sflag [#allocation4], %s2378_s6 }
  0x6c   : > { %v1737_v49 = vld [vmem:[%s2390_s26 + $0xd4] sm:$0xf0]  ;;  %v1545_v50 = vld [vmem:[%s2390_s26 + $0x1c8] sm:$0xf]  ;;  %v1419_v55 = vld [vmem:[%s2390_s26 + $0xd8] sm:$0xf0]  ;;  %v2489_v56 = vpack.c.bf16 %v301_v45, %v299_v44 }
  0x6d   : > { %694 = vmatpush.bf16.msra.mxu0 %v1330_v17  ;;  %v1769_v53 = vld [vmem:[%s2390_s26 + $0x1d4] sm:$0xf0]  ;;  %v1767_v57 = vld [vmem:[%s2390_s26 + $0x1cc] sm:$0xf]  ;;  %v1547_v58 = vld [vmem:[%s2390_s26 + $0x1d8] sm:$0xf0]  ;;  %v1418_v59 = vor.u32 %v1737_v49, %v1417_v48  ;;  %v1422_v61 = vor.u32 %v1735_v54, %v1419_v55 }
  0x6e   : > { %708 = vmatpush.bf16.msra.mxu1 %v1458_v21  ;;  %722 = vmatpush.bf16.msra.mxu2 %v1334_v22  ;;  %v1546_v60 = vor.u32 %v1769_v53, %v1545_v50  ;;  %v1401_v62 = vld [vmem:[%s2390_s26 + $0xa8] sm:$0xf]  ;;  %v1733_v63 = vld [vmem:[%s2390_s26 + $0xb4] sm:$0xf0]  ;;  %v1550_v1 = vor.u32 %v1767_v57, %v1547_v58  ;;  %v1731_v3 = vld [vmem:[%s2390_s26 + $0xac] sm:$0xf] }
  0x6f   : > { %736 = vmatpush.bf16.msra.mxu3 %v1462_v26  ;;  %v1529_v0 = vld [vmem:[%s2390_s26 + $0x1a8] sm:$0xf]  ;;  %v1765_v2 = vld [vmem:[%s2390_s26 + $0x1b4] sm:$0xf0]  ;;  %v1403_v4 = vld [vmem:[%s2390_s26 + $0xb8] sm:$0xf0]  ;;  %v1402_v7 = vor.u32 %v1733_v63, %v1401_v62 }
  0x70   : > { %v1763_v5 = vld [vmem:[%s2390_s26 + $0x1ac] sm:$0xf]  ;;  %v1531_v6 = vld [vmem:[%s2390_s26 + $0x1b8] sm:$0xf0]  ;;  %v1530_v8 = vor.u32 %v1765_v2, %v1529_v0  ;;  %v1406_v9 = vor.u32 %v1731_v3, %v1403_v4  ;;  %v1385_v10 = vld [vmem:[%s2390_s26 + $0x88] sm:$0xf] }
  0x71   : > { %695 = vmatpush.bf16.msra.mxu0 %v1314_v33  ;;  %v1729_v11 = vld [vmem:[%s2390_s26 + $0x94] sm:$0xf0]  ;;  %v1513_v12 = vld [vmem:[%s2390_s26 + $0x188] sm:$0xf]  ;;  %v1534_v13 = vor.u32 %v1763_v5, %v1531_v6  ;;  %v1727_v15 = vld [vmem:[%s2390_s26 + $0x8c] sm:$0xf] }
  0x72   : > { %709 = vmatpush.bf16.msra.mxu1 %v1442_v37  ;;  %723 = vmatpush.bf16.msra.mxu2 %v1318_v38  ;;  %v1761_v14 = vld [vmem:[%s2390_s26 + $0x194] sm:$0xf0]  ;;  %v1387_v16 = vld [vmem:[%s2390_s26 + $0x98] sm:$0xf0]  ;;  %v1759_v17 = vld [vmem:[%s2390_s26 + $0x18c] sm:$0xf]  ;;  %v1386_v19 = vor.u32 %v1729_v11, %v1385_v10 }
  0x73   : > { %737 = vmatpush.bf16.msra.mxu3 %v1446_v42  ;;  %v1515_v18 = vld [vmem:[%s2390_s26 + $0x198] sm:$0xf0]  ;;  %v1514_v20 = vor.u32 %v1761_v14, %v1513_v12  ;;  %v1390_v21 = vor.u32 %v1727_v15, %v1387_v16  ;;  %v1369_v22 = vld [vmem:[%s2390_s26 + $0x68] sm:$0xf]  ;;  %v1725_v23 = vld [vmem:[%s2390_s26 + $0x74] sm:$0xf0] }
  0x74   : > { %696 = vmatmul.bf16.vlgmr.msra.gmra.mxu0 %v2484_v52  ;;  %v1497_v24 = vld [vmem:[%s2390_s26 + $0x168] sm:$0xf]  ;;  %v1518_v25 = vor.u32 %v1759_v17, %v1515_v18  ;;  %v1757_v26 = vld [vmem:[%s2390_s26 + $0x174] sm:$0xf0]  ;;  %v1723_v27 = vld [vmem:[%s2390_s26 + $0x6c] sm:$0xf]  ;;  %v1370_v31 = vor.u32 %v1725_v23, %v1369_v22 }
  0x75   : > { %744 = vmatpush.bf16.msrb.mxu0 %v1434_v43  ;;  %710 = vmatmul.bf16.vlgmr.msra.gmra.mxu1 %v2489_v56  ;;  %v1371_v28 = vld [vmem:[%s2390_s26 + $0x78] sm:$0xf0]  ;;  %v1755_v29 = vld [vmem:[%s2390_s26 + $0x16c] sm:$0xf]  ;;  %v1498_v32 = vor.u32 %v1757_v26, %v1497_v24  ;;  %v1353_v34 = vld [vmem:[%s2390_s26 + $0x48] sm:$0xf] }
  0x76   : > { %758 = vmatpush.bf16.msrb.mxu1 %v1562_v46  ;;  %772 = vmatpush.bf16.msrb.mxu2 %v1438_v47  ;;  %v1499_v30 = vld [vmem:[%s2390_s26 + $0x178] sm:$0xf0]  ;;  %v1374_v33 = vor.u32 %v1723_v27, %v1371_v28  ;;  %v1721_v35 = vld [vmem:[%s2390_s26 + $0x54] sm:$0xf0]  ;;  %v1481_v36 = vld [vmem:[%s2390_s26 + $0x148] sm:$0xf] }
  0x77   : > { %786 = vmatpush.bf16.msrb.mxu3 %v1566_v51  ;;  %724 = vmatmul.bf16.vlgmr.msra.gmra.mxu2 %v2484_v52  ;;  %v1502_v37 = vor.u32 %v1755_v29, %v1499_v30  ;;  %v1753_v38 = vld [vmem:[%s2390_s26 + $0x154] sm:$0xf0]  ;;  %v1719_v39 = vld [vmem:[%s2390_s26 + $0x4c] sm:$0xf]  ;;  %v1355_v40 = vld [vmem:[%s2390_s26 + $0x58] sm:$0xf0]  ;;  %v1354_v43 = vor.u32 %v1721_v35, %v1353_v34 }
  0x78   : > { %738 = vmatmul.bf16.vlgmr.msra.gmra.mxu3 %v2489_v56  ;;  %v1751_v41 = vld [vmem:[%s2390_s26 + $0x14c] sm:$0xf]  ;;  %v1483_v42 = vld [vmem:[%s2390_s26 + $0x158] sm:$0xf0]  ;;  %v1482_v44 = vor.u32 %v1753_v38, %v1481_v36  ;;  %v1358_v45 = vor.u32 %v1719_v39, %v1355_v40  ;;  %v1337_v46 = vld [vmem:[%s2390_s26 + $0x28] sm:$0xf] }
  0x79   : > { %745 = vmatpush.bf16.msrb.mxu0 %v1418_v59  ;;  %v1717_v47 = vld [vmem:[%s2390_s26 + $0x34] sm:$0xf0]  ;;  %v1465_v48 = vld [vmem:[%s2390_s26 + $0x128] sm:$0xf]  ;;  %v1486_v49 = vor.u32 %v1751_v41, %v1483_v42  ;;  %v1715_v51 = vld [vmem:[%s2390_s26 + $0x2c] sm:$0xf] }
  0x7a   : > { %759 = vmatpush.bf16.msrb.mxu1 %v1546_v60  ;;  %773 = vmatpush.bf16.msrb.mxu2 %v1422_v61  ;;  %v1749_v50 = vld [vmem:[%s2390_s26 + $0x134] sm:$0xf0]  ;;  %v1339_v53 = vld [vmem:[%s2390_s26 + $0x38] sm:$0xf0]  ;;  %v1747_v54 = vld [vmem:[%s2390_s26 + $0x12c] sm:$0xf]  ;;  %v1338_v57 = vor.u32 %v1717_v47, %v1337_v46 }
  0x7b   : > { %787 = vmatpush.bf16.msrb.mxu3 %v1550_v1  ;;  %v1467_v55 = vld [vmem:[%s2390_s26 + $0x138] sm:$0xf0]  ;;  %v1466_v58 = vor.u32 %v1749_v50, %v1465_v48  ;;  %v1342_v59 = vor.u32 %v1715_v51, %v1339_v53  ;;  %v1321_v60 = vld [vmem:[%s2390_s26 + $0x8] sm:$0xf]  ;;  %v1713_v61 = vld [vmem:[%s2390_s26 + $0x14] sm:$0xf0] }
  0x7c   : > { %v1449_v62 = vld [vmem:[%s2390_s26 + $0x108] sm:$0xf]  ;;  %v1470_v63 = vor.u32 %v1747_v54, %v1467_v55  ;;  %v1745_v0 = vld [vmem:[%s2390_s26 + $0x114] sm:$0xf0]  ;;  %v1711_v1 = vld [vmem:[%s2390_s26 + $0xc] sm:$0xf]  ;;  %v1322_v5 = vor.u32 %v1713_v61, %v1321_v60 }
  0x7d   : > { %746 = vmatpush.bf16.msrb.mxu0 %v1402_v7  ;;  %v1323_v2 = vld [vmem:[%s2390_s26 + $0x18] sm:$0xf0]  ;;  %v1743_v3 = vld [vmem:[%s2390_s26 + $0x10c] sm:$0xf]  ;;  %v1450_v6 = vor.u32 %v1745_v0, %v1449_v62  ;;  %v1789_v10 = vld [vmem:[%s2396_s28 + $0x74] sm:$0xf0] }
  0x7e   : > { %760 = vmatpush.bf16.msrb.mxu1 %v1530_v8  ;;  %774 = vmatpush.bf16.msrb.mxu2 %v1406_v9  ;;  %v1451_v4 = vld [vmem:[%s2390_s26 + $0x118] sm:$0xf0]  ;;  %v1326_v7 = vor.u32 %v1711_v1, %v1323_v2  ;;  %v1629_v9 = vld [vmem:[%s2396_s28 + $0x70] sm:$0xf]  ;;  %v1788_v11 = vld [vmem:[%s2396_s28 + $0x74] sm:$0xf] }
  0x7f   : > { %788 = vmatpush.bf16.msrb.mxu3 %v1534_v13  ;;  %v1454_v8 = vor.u32 %v1743_v3, %v1451_v4  ;;  %v1630_v12 = vor.u32 %v1789_v10, %v1629_v9  ;;  %v1631_v13 = vld [vmem:[%s2396_s28 + $0x78] sm:$0xf0]  ;;  %v1621_v15 = vld [vmem:[%s2396_s28 + $0x60] sm:$0xf]  ;;  %v1787_v16 = vld [vmem:[%s2396_s28 + $0x64] sm:$0xf0] }
  0x80   : > { %v1634_v14 = vor.u32 %v1788_v11, %v1631_v13  ;;  %v1622_v17 = vor.u32 %v1787_v16, %v1621_v15  ;;  %v1695_v23 = vld [vmem:[%s2396_s28 + $0xf8] sm:$0xf0]  ;;  %v1785_v26 = vld [vmem:[%s2396_s28 + $0x54] sm:$0xf0]  ;;  %v1784_v27 = vld [vmem:[%s2396_s28 + $0x54] sm:$0xf] }
  0x81   : > { %747 = vmatpush.bf16.msrb.mxu0 %v1386_v19  ;;  %v1693_v19 = vld [vmem:[%s2396_s28 + $0xf0] sm:$0xf]  ;;  %v1615_v29 = vld [vmem:[%s2396_s28 + $0x58] sm:$0xf0]  ;;  %v1687_v35 = vld [vmem:[%s2396_s28 + $0xe8] sm:$0xf0] }
  0x82   : > { %761 = vmatpush.bf16.msrb.mxu1 %v1514_v20  ;;  %775 = vmatpush.bf16.msrb.mxu2 %v1390_v21  ;;  %v1805_v20 = vld [vmem:[%s2396_s28 + $0xf4] sm:$0xf0]  ;;  %v1804_v21 = vld [vmem:[%s2396_s28 + $0xf4] sm:$0xf]  ;;  %v1618_v30 = vor.u32 %v1784_v27, %v1615_v29  ;;  %v1783_v38 = vld [vmem:[%s2396_s28 + $0x44] sm:$0xf0] }
  0x83   : > { %789 = vmatpush.bf16.msrb.mxu3 %v1518_v25  ;;  %v1694_v22 = vor.u32 %v1805_v20, %v1693_v19  ;;  %v1698_v24 = vor.u32 %v1804_v21, %v1695_v23  ;;  %v1613_v25 = vld [vmem:[%s2396_s28 + $0x50] sm:$0xf]  ;;  %v1782_v39 = vld [vmem:[%s2396_s28 + $0x44] sm:$0xf]  ;;  %v1607_v41 = vld [vmem:[%s2396_s28 + $0x48] sm:$0xf0] }
  0x84   : > { %v1614_v28 = vor.u32 %v1785_v26, %v1613_v25  ;;  %v1610_v42 = vor.u32 %v1782_v39, %v1607_v41  ;;  %v1679_v47 = vld [vmem:[%s2396_s28 + $0xd8] sm:$0xf0]  ;;  %v1781_v50 = vld [vmem:[%s2396_s28 + $0x34] sm:$0xf0]  ;;  %v1780_v51 = vld [vmem:[%s2396_s28 + $0x34] sm:$0xf] }
  0x85   : > { %748 = vmatpush.bf16.msrb.mxu0 %v1370_v31  ;;  %v1685_v31 = vld [vmem:[%s2396_s28 + $0xe0] sm:$0xf]  ;;  %v1599_v55 = vld [vmem:[%s2396_s28 + $0x38] sm:$0xf0]  ;;  %v1799_v60 = vld [vmem:[%s2396_s28 + $0xc4] sm:$0xf0] }
  0x86   : > { %762 = vmatpush.bf16.msrb.mxu1 %v1498_v32  ;;  %776 = vmatpush.bf16.msrb.mxu2 %v1374_v33  ;;  %v1803_v32 = vld [vmem:[%s2396_s28 + $0xe4] sm:$0xf0]  ;;  %v1802_v33 = vld [vmem:[%s2396_s28 + $0xe4] sm:$0xf]  ;;  %v1671_v0 = vld [vmem:[%s2396_s28 + $0xc8] sm:$0xf0] }
  0x87   : > { %790 = vmatpush.bf16.msrb.mxu3 %v1502_v37  ;;  %v1686_v34 = vor.u32 %v1803_v32, %v1685_v31  ;;  %v1690_v36 = vor.u32 %v1802_v33, %v1687_v35  ;;  %v1605_v37 = vld [vmem:[%s2396_s28 + $0x40] sm:$0xf]  ;;  %v1798_v61 = vld [vmem:[%s2396_s28 + $0xc4] sm:$0xf]  ;;  %v1779_v3 = vld [vmem:[%s2396_s28 + $0x24] sm:$0xf0] }
  0x88   : > { %v1606_v40 = vor.u32 %v1783_v38, %v1605_v37  ;;  %v1674_v1 = vor.u32 %v1798_v61, %v1671_v0  ;;  %v1589_v2 = vld [vmem:[%s2396_s28 + $0x20] sm:$0xf]  ;;  %v1778_v4 = vld [vmem:[%s2396_s28 + $0x24] sm:$0xf]  ;;  %v1661_v9 = vld [vmem:[%s2396_s28 + $0xb0] sm:$0xf] }
  0x89   : > { %749 = vmatpush.bf16.msrb.mxu0 %v1354_v43  ;;  %v1677_v43 = vld [vmem:[%s2396_s28 + $0xd0] sm:$0xf]  ;;  %v1797_v10 = vld [vmem:[%s2396_s28 + $0xb4] sm:$0xf0]  ;;  %v1796_v11 = vld [vmem:[%s2396_s28 + $0xb4] sm:$0xf] }
  0x8a   : > { %763 = vmatpush.bf16.msrb.mxu1 %v1482_v44  ;;  %777 = vmatpush.bf16.msrb.mxu2 %v1358_v45  ;;  %v1801_v44 = vld [vmem:[%s2396_s28 + $0xd4] sm:$0xf0]  ;;  %v1800_v45 = vld [vmem:[%s2396_s28 + $0xd4] sm:$0xf]  ;;  %v1663_v13 = vld [vmem:[%s2396_s28 + $0xb8] sm:$0xf0] }
  0x8b   : > { %791 = vmatpush.bf16.msrb.mxu3 %v1486_v49  ;;  %v1678_v46 = vor.u32 %v1801_v44, %v1677_v43  ;;  %v1682_v48 = vor.u32 %v1800_v45, %v1679_v47  ;;  %v1597_v49 = vld [vmem:[%s2396_s28 + $0x30] sm:$0xf]  ;;  %v1666_v15 = vor.u32 %v1796_v11, %v1663_v13  ;;  %v1583_v20 = vld [vmem:[%s2396_s28 + $0x18] sm:$0xf0]  ;;  %v1795_v25 = vld [vmem:[%s2396_s28 + $0xa4] sm:$0xf0] }
  0x8c   : > { %v1598_v54 = vor.u32 %v1781_v50, %v1597_v49  ;;  %v1581_v16 = vld [vmem:[%s2396_s28 + $0x10] sm:$0xf]  ;;  %v1794_v26 = vld [vmem:[%s2396_s28 + $0xa4] sm:$0xf]  ;;  %v1655_v29 = vld [vmem:[%s2396_s28 + $0xa8] sm:$0xf0] }
  0x8d   : > { %750 = vmatpush.bf16.msrb.mxu0 %v1338_v57  ;;  %v1658_v31 = vor.u32 %v1794_v26, %v1655_v29  ;;  %v1573_v32 = vld [vmem:[%s2396_s28] sm:$0xf]  ;;  %v1775_v33 = vld [vmem:[%s2396_s28 + $0x4] sm:$0xf0]  ;;  %v1774_v37 = vld [vmem:[%s2396_s28 + $0x4] sm:$0xf] }
  0x8e   : > { %764 = vmatpush.bf16.msrb.mxu1 %v1466_v58  ;;  %778 = vmatpush.bf16.msrb.mxu2 %v1342_v59  ;;  %v1602_v58 = vor.u32 %v1780_v51, %v1599_v55  ;;  %v1669_v59 = vld [vmem:[%s2396_s28 + $0xc0] sm:$0xf]  ;;  %v1575_v38 = vld [vmem:[%s2396_s28 + $0x8] sm:$0xf0]  ;;  %v1645_v41 = vld [vmem:[%s2396_s28 + $0x90] sm:$0xf] }
  0x8f   : > { %792 = vmatpush.bf16.msrb.mxu3 %v1470_v63  ;;  %v1670_v63 = vor.u32 %v1799_v60, %v1669_v59  ;;  %v1792_v44 = vld [vmem:[%s2396_s28 + $0x94] sm:$0xf]  ;;  %v1647_v45 = vld [vmem:[%s2396_s28 + $0x98] sm:$0xf0]  ;;  %v1637_v50 = vld [vmem:[%s2396_s28 + $0x80] sm:$0xf] }
  0x90   : > { %v1791_v51 = vld [vmem:[%s2396_s28 + $0x84] sm:$0xf0]  ;;  %v1639_v55 = vld [vmem:[%s2396_s28 + $0x88] sm:$0xf0]  ;;  %s1807_s7 = sshll.u32 %s2753_s18, 5  ;;  %s2054_s19 = scalar_lea.hbm %s2754_s4, 64 }
  0x91   : > { %751 = vmatpush.bf16.msrb.mxu0 %v1322_v5  ;;  %s1159_s29 = scalar_lea.hbm %s2754_s4, %s1807_s7 }
  0x92   : > { %765 = vmatpush.bf16.msrb.mxu1 %v1450_v6  ;;  %779 = vmatpush.bf16.msrb.mxu2 %v1326_v7  ;;  %v1590_v6 = vor.u32 %v1779_v3, %v1589_v2  ;;  %v1591_v7 = vld [vmem:[%s2396_s28 + $0x28] sm:$0xf0]  ;;  %s1162_s23 = sshll.u32 %s1159_s29, 4  ;;  %s1163_s23 = int_to_ptr.hbm [resolvable:$true] %s1162_s23 }
  0x93   : > { %793 = vmatpush.bf16.msrb.mxu3 %v1454_v8  ;;  %v1594_v8 = vor.u32 %v1778_v4, %v1591_v7  ;;  %s2048_s5 = sshra.s32 %s1163_s23, 4  ;;  %s2049_s5 = int_to_ptr.hbm [resolvable:$true] %s2048_s5 }
  0x94   : > { %752 = vmatmul.bf16.vlgmr.msrb.gmra.mxu0 %v2484_v52  ;;  %s2050_s9 = scalar_lea.hbm %s2049_s5, 32  ;;  %p2055_p2 = scmp.lt.s32.totalorder %s2049_s5, %s2754_s4 }
  0x95   : > { %766 = vmatmul.bf16.vlgmr.msrb.gmra.mxu1 %v2489_v56  ;;  %780 = vmatmul.bf16.vlgmr.msrb.gmra.mxu2 %v2484_v52  ;;  %v1786_v52 = vld [vmem:[%s2396_s28 + $0x64] sm:$0xf]  ;;  %p2051_p7 = scmp.ne.s32.totalorder %s2049_s5, %s2050_s9  ;;  %p2056_p4 = scmp.lt.s32.totalorder %s2054_s19, %s2050_s9 }
  0x96   : > { %794 = vmatmul.bf16.vlgmr.msrb.gmra.mxu3 %v2489_v56  ;;  %1082 = vmatpush.bf16.msra.mxu0 %v1630_v12  ;;  %v1623_v56 = vld [vmem:[%s2396_s28 + $0x68] sm:$0xf0]  ;;  %v1662_v12 = vor.u32 %v1797_v10, %v1661_v9 }
  0x97   : > { %1110 = vmatpush.bf16.msra.mxu2 %v1634_v14  ;;  %v1626_v18 = vor.u32 %v1786_v52, %v1623_v56  ;;  %1096 = vmatpush.bf16.msra.mxu1 %v1694_v22  ;;  %v1777_v52 = vld [vmem:[%s2396_s28 + $0x14] sm:$0xf0]  ;;  %p2052_p10 = pnand %p2051_p7, %p2340_p0  ;;  %p2057_p6 = por %p2056_p4, %p2055_p2 }
  0x98   : > { %1124 = vmatpush.bf16.msra.mxu3 %v1698_v24  ;;  %v1582_v19 = vor.u32 %v1777_v52, %v1581_v16  ;;  %v1653_v24 = vld [vmem:[%s2396_s28 + $0xa0] sm:$0xf] }
  0x99   : > { %p2053_p12 = pneg %p2052_p10 }
  0x9a   : > { %1083 = vmatpush.bf16.msra.mxu0 %v1622_v17  ;;  %v1776_v17 = vld [vmem:[%s2396_s28 + $0x14] sm:$0xf] }
  0x9b   : > { %1111 = vmatpush.bf16.msra.mxu2 %v1626_v18  ;;  %1097 = vmatpush.bf16.msra.mxu1 %v1686_v34  ;;  %v1586_v23 = vor.u32 %v1776_v17, %v1583_v20  ;;  %p2058_p8 = pnand %p2057_p6, %p2053_p12 }
  0x9c   : > { %1125 = vmatpush.bf16.msra.mxu3 %v1690_v36  ;;  %v1574_v36 = vor.u32 %v1775_v33, %v1573_v32 }
  0x9e   : > { %1084 = vmatpush.bf16.msra.mxu0 %v1614_v28  ;;  %v1654_v28 = vor.u32 %v1795_v25, %v1653_v24 }
  0x9f   : > { %1112 = vmatpush.bf16.msra.mxu2 %v1618_v30  ;;  %1098 = vmatpush.bf16.msra.mxu1 %v1678_v46 }
  0xa0   : > { %1126 = vmatpush.bf16.msra.mxu3 %v1682_v48  ;;  %v1650_v48 = vor.u32 %v1792_v44, %v1647_v45 }
  0xa2   : > { %1085 = vmatpush.bf16.msra.mxu0 %v1606_v40  ;;  %v1578_v40 = vor.u32 %v1774_v37, %v1575_v38 }
  0xa3   : > { %1113 = vmatpush.bf16.msra.mxu2 %v1610_v42  ;;  %1099 = vmatpush.bf16.msra.mxu1 %v1670_v63  ;;  %v1793_v42 = vld [vmem:[%s2396_s28 + $0x94] sm:$0xf0] }
  0xa4   : > { %1127 = vmatpush.bf16.msra.mxu3 %v1674_v1  ;;  %v1646_v43 = vor.u32 %v1793_v42, %v1645_v41 }
  0xa6   : > { %1086 = vmatpush.bf16.msra.mxu0 %v1598_v54  ;;  %v1790_v54 = vld [vmem:[%s2396_s28 + $0x84] sm:$0xf] }
  0xa7   : > { %1114 = vmatpush.bf16.msra.mxu2 %v1602_v58  ;;  %1100 = vmatpush.bf16.msra.mxu1 %v1662_v12  ;;  %v1642_v59 = vor.u32 %v1790_v54, %v1639_v55 }
  0xa8   : > { %1128 = vmatpush.bf16.msra.mxu3 %v1666_v15 }
  0xaa   : > { %1087 = vmatpush.bf16.msra.mxu0 %v1590_v6 }
  0xab   : > { %1115 = vmatpush.bf16.msra.mxu2 %v1594_v8  ;;  %1101 = vmatpush.bf16.msra.mxu1 %v1654_v28 }
  0xac   : > { %1129 = vmatpush.bf16.msra.mxu3 %v1658_v31 }
  0xae   : > { %1088 = vmatpush.bf16.msra.mxu0 %v1582_v19 }
  0xaf   : > { %1116 = vmatpush.bf16.msra.mxu2 %v1586_v23  ;;  %1102 = vmatpush.bf16.msra.mxu1 %v1646_v43 }
  0xb0   : > { %1130 = vmatpush.bf16.msra.mxu3 %v1650_v48 }
  0xb2   : > { %1089 = vmatpush.bf16.msra.mxu0 %v1574_v36 }
  0xb3   : > { %1117 = vmatpush.bf16.msra.mxu2 %v1578_v40 }
  0xb4   : > { %1131 = vmatpush.bf16.msra.mxu3 %v1642_v59 }
  0xf1   : > { %v697_v53 = vpop.f32.mrf.mxu0 }
  0xf2   : > { %v711_v57 = vpop.f32.mrf.mxu1 }
  0xf3   : > { %v2584_v62 = vadd.f32 %v711_v57, %v697_v53  ;;  %v1638_v53 = vor.u32 %v1791_v51, %v1637_v50 }
  0xf5   : > { %v1567_v5 = vmul.f32 -1.442695, %v2584_v62  ;;  %1103 = vmatpush.bf16.msra.mxu1 %v1638_v53 }
  0xf7   : > { %1928 = vpow2.f32 %v1567_v5 }
  0xf9   : > { %v699_v18 = vpop.f32.mrf.mxu0 }
  0xfa   : > { %v725_v14 = vpop.f32.mrf.mxu2  ;;  %v713_v22 = vpop.f32.mrf.mxu1 }
  0xfb   : > { %v739_v56 = vpop.f32.mrf.mxu3  ;;  %v2605_v27 = vadd.f32 %v713_v22, %v699_v18 }
  0xfc   : > { %v2600_v21 = vadd.f32 %v739_v56, %v725_v14 }
  0xfd   : > { %v1929_v34 = vpop.eup %1928  ;;  %v1569_v35 = vmul.f32 -1.442695, %v2605_v27 }
  0xfe   : > { %v1568_v30 = vmul.f32 -1.442695, %v2600_v21  ;;  %v812_v39 = vadd.f32 1.0, %v1929_v34 }
 0x100   : > { %1930 = vpow2.f32 %v1568_v30  ;;  %vm821_vm0 = vweird.f32 %v812_v39  ;;  %v827_v9 = vand.u32 2147483648, %v812_v39  ;;  %v825_v12 = vand.u32 2147483647, %v812_v39 }
 0x101   : > { %1932 = vpow2.f32 %v1569_v35 }
 0x102   : > { %1934 = vrcp.f32 %v812_v39  ;;  %v727_v46 = vpop.f32.mrf.mxu2  ;;  %v828_v17 = vor.u32 1.1754944e-38, %v827_v9  ;;  %vm826_vm3 = vcmp.eq.f32.partialorder %v825_v12, 8.507059e+37 }
 0x103   : > { %v741_v47 = vpop.f32.mrf.mxu3 }
 0x104   : > { %v2618_v49 = vadd.f32 %v741_v47, %v727_v46 }
 0x106   : > { %v1931_v57 = vpop.eup %1930  ;;  %v1570_v58 = vmul.f32 -1.442695, %v2618_v49 }
 0x107   : > { %v1933_v60 = vpop.eup %1932  ;;  %v2625_v61 = vadd.f32 1.0, %v1931_v57 }
 0x108   : > { %v1935_v63 = vpop.eup %1934  ;;  %v814_v0 = vadd.f32 1.0, %v1933_v60  ;;  %1936 = vpow2.f32 %v1570_v58 }
 0x109   : > { %v817_v1 = vmul.f32 %v1935_v63, %v812_v39  ;;  %1938 = vrcp.f32 %v2625_v61  ;;  %vm822_vm1 = vweird.f32 %v1935_v63  ;;  %v842_v25 = vand.u32 2147483648, %v2625_v61 }
 0x10a   : > { %1940 = vrcp.f32 %v814_v0  ;;  %vm823_vm2 = vmor %vm821_vm0, %vm822_vm1  ;;  %v857_v18 = vand.u32 2147483648, %v814_v0  ;;  %v855_v20 = vand.u32 2147483647, %v814_v0  ;;  %vm851_vm6 = vweird.f32 %v814_v0 }
 0x10b   : > { %v818_v2 = vsub.f32 1.0, %v817_v1  ;;  %vm836_vm7 = vweird.f32 %v2625_v61  ;;  %v840_v29 = vand.u32 2147483647, %v2625_v61  ;;  %v843_v43 = vor.u32 1.1754944e-38, %v842_v25 }
 0x10c   : > { %v858_v30 = vor.u32 1.1754944e-38, %v857_v18  ;;  %vm856_vm10 = vcmp.eq.f32.partialorder %v855_v20, 8.507059e+37 }
 0x10d   : > { %v819_v3 = vmul.f32 %v1935_v63, %v818_v2  ;;  %vm841_vm11 = vcmp.eq.f32.partialorder %v840_v29, 8.507059e+37 }
 0x10e   : > { %v1937_v4 = vpop.eup %1936 }
 0x10f   : > { %v1939_v5 = vpop.eup %1938  ;;  %v820_v6 = vadd.f32 %v1935_v63, %v819_v3  ;;  %v2628_v7 = vadd.f32 1.0, %v1937_v4  ;;  %v884_v3 = vld [vmem:[%s2398_s10] sm:$0xff] }
 0x110   : > { %v1941_v8 = vpop.eup %1940  ;;  %v832_v10 = vmul.f32 %v1939_v5, %v2625_v61  ;;  %vm837_vm5 = vweird.f32 %v1939_v5 }
 0x111   : > { %v753_v11 = vpop.f32.mrf.mxu0  ;;  %v847_v13 = vmul.f32 %v1941_v8, %v814_v0  ;;  %1942 = vrcp.f32 %v2628_v7  ;;  %v824_v16 = vsel %vm823_vm2, %v1935_v63, %v820_v6  ;;  %vm852_vm4 = vweird.f32 %v1941_v8  ;;  %vm2637_vm9 = vmor %vm836_vm7, %vm837_vm5 }
 0x112   : > { %v767_v14 = vpop.f32.mrf.mxu1  ;;  %v833_v15 = vsub.f32 1.0, %v832_v10  ;;  %v829_v22 = vsel %vm826_vm3, %v828_v17, %v824_v16  ;;  %vm853_vm8 = vmor %vm851_vm6, %vm852_vm4  ;;  %v872_v45 = vand.u32 2147483648, %v2628_v7  ;;  %v870_v46 = vand.u32 2147483647, %v2628_v7 }
 0x113   : > { %v848_v52 = vsub.f32 1.0, %v847_v13  ;;  %v876_v34 = vmul.f32 %v829_v22, %v2584_v62  ;;  %v768_v37 = vadd.f32 %v767_v14, %v753_v11  ;;  %vm866_vm13 = vweird.f32 %v2628_v7  ;;  %v886_v11 = vld [vmem:[%s2398_s10 + $0x10] sm:$0xff] }
 0x114   : > { %v834_v56 = vmul.f32 %v1939_v5, %v833_v15  ;;  %v873_v53 = vor.u32 1.1754944e-38, %v872_v45  ;;  %vm871_vm15 = vcmp.eq.f32.partialorder %v870_v46, 8.507059e+37 }
 0x115   : > { %v849_v19 = vmul.f32 %v1941_v8, %v848_v52  ;;  %v880_v48 = vmul.f32 %v876_v34, %v768_v37  ;;  %v887_v52 = vld [vmem:[%s2398_s10 + $0x18] sm:$0xff] }
 0x116   : > { %v835_v23 = vadd.f32 %v1939_v5, %v834_v56 }
 0x117   : > { %v1943_v24 = vpop.eup %1942  ;;  %v850_v26 = vadd.f32 %v1941_v8, %v849_v19 }
 0x118   : > { %v781_v28 = vpop.f32.mrf.mxu2  ;;  %v862_v31 = vmul.f32 %v1943_v24, %v2628_v7  ;;  %v839_v39 = vsel %vm2637_vm9, %v1939_v5, %v835_v23  ;;  %vm867_vm12 = vweird.f32 %v1943_v24 }
 0x119   : > { %v795_v32 = vpop.f32.mrf.mxu3  ;;  %v755_v33 = vpop.f32.mrf.mxu0  ;;  %v854_v36 = vsel %vm853_vm8, %v1941_v8, %v850_v26  ;;  %v844_v47 = vsel %vm841_vm11, %v843_v43, %v839_v39  ;;  %vm868_vm14 = vmor %vm866_vm13, %vm867_vm12  ;;  %v885_v8 = vld [vmem:[%s2398_s10 + $0x8] sm:$0xff] }
 0x11a   : > { %v769_v38 = vpop.f32.mrf.mxu1  ;;  %v859_v40 = vsel %vm856_vm10, %v858_v30, %v854_v36  ;;  %v863_v41 = vsub.f32 1.0, %v862_v31  ;;  %v877_v57 = vmul.f32 %v844_v47, %v2600_v21  ;;  %v796_v58 = vadd.f32 %v795_v32, %v781_v28 }
 0x11b   : > { %v770_v42 = vadd.f32 %v769_v38, %v755_v33  ;;  %v878_v44 = vmul.f32 %v859_v40, %v2605_v27 }
 0x11c   : > { %v864_v62 = vmul.f32 %v1943_v24, %v863_v41  ;;  %v881_v0 = vmul.f32 %v877_v57, %v796_v58 }
 0x11d   : > { %v882_v50 = vmul.f32 %v878_v44, %v770_v42 }
 0x11e   : > { %v865_v51 = vadd.f32 %v1943_v24, %v864_v62 }
 0x11f   : > { %v888_v54 = vpack.c.bf16 %v882_v50, %v880_v48 }
 0x120   : > { %v783_v55 = vpop.f32.mrf.mxu2  ;;  %v869_v27 = vsel %vm868_vm14, %v1943_v24, %v865_v51 }
 0x121   : > { %v797_v59 = vpop.f32.mrf.mxu3  ;;  %v874_v60 = vsel %vm871_vm15, %v873_v53, %v869_v27  ;;  %1090 = vmatmul.bf16.vlgmr.msra.gmra.mxu0 %v888_v54  ;;  %1118 = vmatmul.bf16.vlgmr.msra.gmra.mxu2 %v888_v54 }
 0x122   : > { %v798_v61 = vadd.f32 %v797_v59, %v783_v55  ;;  %v879_v63 = vmul.f32 %v874_v60, %v2618_v49 }
 0x124   : > { %v883_v1 = vmul.f32 %v879_v63, %v798_v61 }
 0x126   : > { %v889_v2 = vpack.c.bf16 %v883_v1, %v881_v0 }
 0x128   : > { %1104 = vmatmul.bf16.vlgmr.msra.gmra.mxu1 %v889_v2  ;;  %1132 = vmatmul.bf16.vlgmr.msra.gmra.mxu3 %v889_v2 }
 0x19e   : > { %v1091_v21 = vpop.f32.mrf.mxu0 }
 0x1a4   : > { %v1119_v7 = vpop.f32.mrf.mxu2 }
 0x1a5   : > { %v1105_v4 = vpop.f32.mrf.mxu1 }
 0x1a6   : > { %v1106_v5 = vadd.f32 %v1105_v4, %v1091_v21  ;;  %v1093_v10 = vpop.f32.mrf.mxu0 }
 0x1a8   : > { %v1138_v6 = vadd.f32 %v1106_v5, %v884_v3 }
 0x1aa   : > { %1142 = vst [vmem:[%s2398_s10] sm:$0xff] %v1138_v6 }
 0x1ab   : > { %v1133_v49 = vpop.f32.mrf.mxu3 }
 0x1ac   : > { %v1134_v9 = vadd.f32 %v1133_v49, %v1119_v7  ;;  %v1121_v16 = vpop.f32.mrf.mxu2 }
 0x1ad   : > { %v1107_v12 = vpop.f32.mrf.mxu1 }
 0x1ae   : > { %v1139_v13 = vadd.f32 %v1134_v9, %v885_v8  ;;  %v1108_v14 = vadd.f32 %v1107_v12, %v1093_v10 }
 0x1b0   : > { %1143 = vst [vmem:[%s2398_s10 + $0x8] sm:$0xff] %v1139_v13  ;;  %v1140_v15 = vadd.f32 %v1108_v14, %v886_v11 }
 0x1b2   : > { %1144 = vst [vmem:[%s2398_s10 + $0x10] sm:$0xff] %v1140_v15 }
 0x1b3   : > { %v1135_v17 = vpop.f32.mrf.mxu3 }
 0x1b4   : > { %v1136_v56 = vadd.f32 %v1135_v17, %v1121_v16 }
 0x1b6   : > { %v1141_v18 = vadd.f32 %v1136_v56, %v887_v52 }
 0x1b8   : > { %1145 = vst [vmem:[%s2398_s10 + $0x18] sm:$0xff] %v1141_v18 }
 0x1b9   : > { %2061 = shalt.err (!%p2058_p8)
}
 0x1ba   : > { %s2168_s6 = smov 256   ;;  %s2169_s25 = smov 16  }
 0x1bb   : > { %1814 = dma.vmem_to_hbm [thread:$0]  (%p2340_p0), %s1161_s3, 512, %s1163_s23, %s1147_s8, %s2168_s6, %s2168_s6, %s2169_s25  }
 0x1bc PF: > { %p1831_p1 = scmp.ge.s32.totalorder %s2160_s22, 2  ;;  %s1177_s26 = sand.u32 1, %s2132_s15  }
 0x1bd   : > { %s1178_s12 = scalar_lea.sflag [#allocation4], %s1177_s26 }
 0x1be   : > { %p1827_p9 = pnand %p1831_p1, %p2352_p3 }
 0x1c0   : > { %p1828_p13 = pneg %p1827_p9 }
 0x1c2   : > { %2115 = dma.done.wait (%p1828_p13), %s1178_s12, 512  }
 0x1c3   : > { %2117 = vsyncadd (%p1828_p13), %s1178_s12, 4294966784  ;;  %s22_s22 = sadd.s32 1, %s2160_s22   ;;  %s2757_s28 = sld [smem:[#allocation16_spill]] }
 0x1c4   : > { %p19_p11 = scmp.ge.s32.totalorder %s22_s22, 8   ;;  %s2758_s10 = sld [smem:[#allocation12_spill]] }
 0x1c5   : > { %s2759_s17 = sld [smem:[#allocation19_spill]]  ;;  %s2763_s12 = smov %s2124_s13 }
 0x1c6   : > { %s2760_s19 = sld [smem:[#allocation14_spill]]  ;;  %s2764_s13 = smov %s2128_s14 }
 0x1c7   : > { %s2761_s7 = sld [smem:[#allocation15_spill]]  ;;  %s2766_s15 = smov %s2136_s16 }
 0x1c8   : > { %s2762_s21 = sld [smem:[#allocation17_spill]]  ;;  %s2768_s18 = smov %s2152_s20 }
 0x1c9   : > { %s2765_s14 = smov %s2757_s28  ;;  %21 = sbr.rel (!%p19_p11) target bundleno = 15 (0xf), region = 105 }
 0x1ca   : > { %s2767_s16 = smov %s2758_s10 }
 0x1cd   : > { %s2769_s20 = smov %s2761_s7 }
 0x1ce   :  { %1184 = vsyncpa [#allocation3], 1 }
 0x1cf   :  { %1186 = vsyncpa [#allocation3 + $0x1], 1 }
 0x1d0   :  { %1187 = vsyncpa [#allocation6], 1 }
 0x1d1   :  { %1189 = vsyncpa [#allocation6 + $0x1], 1 }
 0x1d2   :  { %1190 = vsyncpa [#allocation4], 1 }
 0x1d3   :  { %1192 = vsyncpa [#allocation4 + $0x1], 1 }

</bundles_post_ra>
